<compile_context>
chip_gen: v6e
topology: v6e:2x2x1
jax: 0.10.0
libtpu: 0.0.40
codegen_flags: <defaults>
</compile_context>

<pallas_src>
import functools

import jax
import jax.numpy as jnp
from jax.experimental import pallas as pl
from jax.experimental.pallas import tpu as pltpu

_LANE = 128


def _polyloss_kernel(pred_ref, labels_ref, weight_ref, out_ref, acc_ref, *,
                     epsilon, n_valid, sub, tiles_per_split):
    c = pl.program_id(0)          # parallel split (v7x: one per TensorCore)
    j = pl.program_id(1)          # sequential tile within the split

    @pl.when(j == 0)
    def _():
        acc_ref[...] = jnp.zeros_like(acc_ref)

    logits = pred_ref[...].astype(jnp.float32)      # (C, SUB, 128): classes on slab axis
    labels = labels_ref[...]                        # (SUB, 128) int32
    w = weight_ref[...]                             # (C, 1, 1) f32 class weights

    # log-softmax over the class (leading slab) axis.  With classes on the leading axis
    # every reduction below is an element-wise op between dense (SUB,128) slabs (VALU),
    # not a sublane reduction.
    m = jnp.max(logits, axis=0, keepdims=True)                    # (1, SUB, 128)
    shifted = logits - m
    sum_exp = jnp.sum(jnp.exp(shifted), axis=0, keepdims=True)    # (1, SUB, 128)
    lsm = shifted - jnp.log(sum_exp)                              # (C, SUB, 128)

    classes = jax.lax.broadcasted_iota(jnp.int32, lsm.shape, 0)
    is_true = classes == labels[None]                             # (C, SUB, 128)

    # Weighted CE and true-class log-prob via NaN-safe selects (no multiply-by-mask).
    ce = jnp.sum(jnp.where(is_true, (-w) * lsm, 0.0), axis=0)     # (SUB, 128)
    lsm_true = jnp.sum(jnp.where(is_true, lsm, 0.0), axis=0)      # (SUB, 128)
    # p_t = exp(lsm_true): one (SUB,128) exp instead of a second full (C,SUB,128) exp.
    contrib = ce - epsilon * jnp.exp(lsm_true)                    # (SUB, 128)

    # Global-sample-index mask: covers the pad-to-128 tail, partially out-of-bounds
    # last tiles and fully out-of-range (clamped) tiles — no padding to tile size.
    base_row = (c * tiles_per_split + j) * sub
    row_ids = jax.lax.broadcasted_iota(jnp.int32, (sub, _LANE), 0)
    lane_ids = jax.lax.broadcasted_iota(jnp.int32, (sub, _LANE), 1)
    sample_idx = (base_row + row_ids) * _LANE + lane_ids
    acc_ref[...] += jnp.where(sample_idx < n_valid, contrib, 0.0)

    @pl.when(j == pl.num_programs(1) - 1)
    def _():
        # Single cross-lane collapse per split; mean / +epsilon finish in the wrapper.
        out_ref[...] = jnp.sum(acc_ref[...]).reshape(1, 1, 1)


def _poly_loss_xla(predicted, labels, weight_loss, epsilon):
    """Plain-XLA fallback for tiny N (kernel launch overhead dominates)."""
    logits = predicted.astype(jnp.float32)
    lsm = jax.nn.log_softmax(logits, axis=-1)
    lsm_true = jnp.take_along_axis(lsm, labels.astype(jnp.int32)[:, None], axis=-1)[:, 0]
    ce = weight_loss.astype(jnp.float32)[labels] * (-lsm_true)
    return jnp.mean(ce + epsilon * (1.0 - jnp.exp(lsm_true)))


def poly_loss(predicted, labels, weight_loss, epsilon=1.0, *,
              block_rows=1024, class_major=False, xla_fallback_n=0):
    """PolyLoss = mean_n( w[y_n]*(-log_softmax(x_n)[y_n]) + eps*(1 - softmax(x_n)[y_n]) ).

    predicted:   (N, C) float logits (f32 or bf16), or (C, N) if class_major=True.
    labels:      (N,) int class indices.
    weight_loss: (C,) float class weights.
    block_rows:  sublane-rows (of 128 samples) per grid step; 1024 -> 131072 samples/step.
    """
    if class_major:
        C, N = predicted.shape
    else:
        N, C = predicted.shape

    if N < xla_fallback_n:
        pred_nc = predicted.T if class_major else predicted
        return _poly_loss_xla(pred_nc, labels, weight_loss, epsilon)

    # TODO(synk): if the producer can emit class-major (C, N) logits, pass
    # class_major=True and this full-array transpose (one extra HBM pass) disappears.
    pred_t = predicted if class_major else jnp.transpose(predicted, (1, 0))  # (C, N)

    # TODO(synk): accept int8/int16 labels end-to-end to cut label DMA bytes; kept int32
    # here because a wrapper-side downcast copy would cost more than it saves.
    labels_i = labels if labels.dtype == jnp.int32 else labels.astype(jnp.int32)

    # Pad only up to the next multiple of 128 (needed for the free contiguous reshape);
    # no padding to tile size — ragged tiles are masked in-kernel.
    n_pad = ((N + _LANE - 1) // _LANE) * _LANE
    if n_pad != N:
        pred_t = jnp.pad(pred_t, ((0, 0), (0, n_pad - N)))
        labels_i = jnp.pad(labels_i, (0, n_pad - N))
    num_rows = n_pad // _LANE

    pred3 = pred_t.reshape(C, num_rows, _LANE)        # contiguous (free) reshape
    lab2 = labels_i.reshape(num_rows, _LANE)
    w3 = weight_loss.reshape(C, 1, 1).astype(jnp.float32)

    # Tile size: `sub` sublane-rows x 128 lanes per step, multiple of 8 (16 when
    # possible, for bf16 packing) or equal to the full row dimension.
    if num_rows <= 8:
        sub = num_rows
    else:
        sub = min(block_rows, num_rows)
        sub -= sub % 8
        if sub >= 16:
            sub -= sub % 16

    tiles_total = (num_rows + sub - 1) // sub
    num_splits = 2 if tiles_total >= 2 else 1         # v7x: one split per TensorCore
    tiles_per_split = (tiles_total + num_splits - 1) // num_splits
    last_blk = tiles_total - 1

    def row_block(c, j):
        # Clamp: tiles past the end re-read the last real block and contribute exactly
        # zero via the in-kernel global-sample-index mask.
        return jnp.minimum(c * tiles_per_split + j, last_blk)

    kernel = functools.partial(
        _polyloss_kernel, epsilon=float(epsilon), n_valid=int(N),
        sub=int(sub), tiles_per_split=int(tiles_per_split))

    partials = pl.pallas_call(
        kernel,
        out_shape=jax.ShapeDtypeStruct((num_splits, 1, 1), jnp.float32),
        grid=(num_splits, tiles_per_split),
        in_specs=[
            pl.BlockSpec((C, sub, _LANE), lambda c, j: (0, row_block(c, j), 0)),
            pl.BlockSpec((sub, _LANE), lambda c, j: (row_block(c, j), 0)),
            pl.BlockSpec((C, 1, 1), lambda c, j: (0, 0, 0)),   # weights stay resident
        ],
        out_specs=pl.BlockSpec((1, 1, 1), lambda c, j: (c, 0, 0)),
        scratch_shapes=[pltpu.VMEM((sub, _LANE), jnp.float32)],
        compiler_params=pltpu.CompilerParams(
            dimension_semantics=("parallel", "arbitrary")),
    )(pred3, lab2, w3)

    # torch.mean over the N real samples; +epsilon folded once (each valid sample
    # contributes exactly +epsilon to the mean).
    return jnp.sum(partials) * jnp.float32(1.0 / N) + jnp.float32(epsilon)


if __name__ == "__main__":
    # Shapes implied by the module: predicted (16, 2), labels (16,), weight (2,)
    N, C = 16, 2
    key = jax.random.PRNGKey(0)
    k_pred, k_lab = jax.random.split(key)
    predicted = jax.random.normal(k_pred, (N, C), dtype=jnp.float32)
    labels = jax.random.randint(k_lab, (N,), 0, C, dtype=jnp.int32)
    weight_loss = jnp.array([1.0, 2.0], dtype=jnp.float32)
    epsilon = 1.0

    loss = poly_loss(predicted, labels, weight_loss, epsilon)
    jax.block_until_ready(loss)

    def reference(pred, lab, w, eps):
        # Mirrors the PyTorch module: weighted CE with reduction='none', then plain mean.
        one_hot = jax.nn.one_hot(lab, pred.shape[1], dtype=jnp.float32)
        sm = jax.nn.softmax(pred, axis=1)
        lsm = jax.nn.log_softmax(pred, axis=1)
        pt = jnp.sum(one_hot * sm, axis=-1)
        ce = w[lab] * (-jnp.sum(one_hot * lsm, axis=-1))
        return jnp.mean(ce + eps * (1.0 - pt))

    ref = reference(predicted, labels, weight_loss, epsilon)
    assert jnp.allclose(loss, ref, atol=1e-5, rtol=1e-4), (loss, ref)

    # Larger ragged check exercising the tiled path: pad-to-128 tail, partial and
    # fully out-of-range (clamped) tiles, and the 2-way parallel split.
    N2, C2 = 4133, 2
    k2p, k2l = jax.random.split(jax.random.PRNGKey(1))
    pred2 = jax.random.normal(k2p, (N2, C2), dtype=jnp.float32)
    lab2 = jax.random.randint(k2l, (N2,), 0, C2, dtype=jnp.int32)
    w2 = jnp.array([0.7, 1.3], dtype=jnp.float32)
    loss2 = poly_loss(pred2, lab2, w2, epsilon, block_rows=8)   # force multiple tiles
    jax.block_until_ready(loss2)
    ref2 = reference(pred2, lab2, w2, epsilon)
    assert jnp.allclose(loss2, ref2, atol=1e-4, rtol=1e-4), (loss2, ref2)

    print("KERNEL_OK")
</pallas_src>

<mosaic_0001>
module attributes {stable_mosaic.version = 11 : i64} {
  func.func @_polyloss_kernel(%arg0: i32, %arg1: i32, %arg2: memref<2x1x128xf32, #tpu.memory_space<vmem>>, %arg3: memref<1x128xi32, #tpu.memory_space<vmem>>, %arg4: memref<2x1x1xf32, #tpu.memory_space<vmem>>, %arg5: memref<1x1x1xf32, #tpu.memory_space<vmem>>, %arg6: memref<1x128xf32, #tpu.memory_space<vmem>>) attributes {dimension_semantics = [#tpu.dimension_semantics<parallel>, #tpu.dimension_semantics<arbitrary>], iteration_bounds = array<i64: 1, 1>, scalar_prefetch = 0 : i64, scratch_operands = 1 : i64, tpu.core_type = #tpu.core_type<tc>, window_params = [{transform_indices = @transform_0, window_bounds = array<i64: 2, 1, 128>}, {transform_indices = @transform_1, window_bounds = array<i64: 1, 128>}, {pipeline_mode = #tpu.pipeline_mode<synchronous>, transform_indices = @transform_2, window_bounds = array<i64: 2, 1, 1>}, {transform_indices = @transform_3, window_bounds = array<i64: 1, 1, 1>}]} {
    %c0_i32 = arith.constant 0 : i32
    %0 = arith.cmpi eq, %arg1, %c0_i32 : i32
    %1 = arith.extui %0 : i1 to i32
    %c0_i32_0 = arith.constant 0 : i32
    %2 = arith.cmpi ne, %1, %c0_i32_0 : i32
    scf.if %2 {
      %cst_23 = arith.constant 0.000000e+00 : f32
      %54 = vector.broadcast %cst_23 : f32 to vector<1x128xf32>
      %c0_24 = arith.constant 0 : index
      %c0_25 = arith.constant 0 : index
      %55 = vector.load %arg6[%c0_24, %c0_25] : memref<1x128xf32, #tpu.memory_space<vmem>>, vector<1x128xf32>
      tpu.vector_store %arg6[%c0_24, %c0_25], %54 {strides = array<i32>} : memref<1x128xf32, #tpu.memory_space<vmem>>, vector<1x128xf32>,
    } else {
    }
    %c0 = arith.constant 0 : index
    %c0_1 = arith.constant 0 : index
    %c0_2 = arith.constant 0 : index
    %3 = vector.load %arg2[%c0, %c0_1, %c0_2] : memref<2x1x128xf32, #tpu.memory_space<vmem>>, vector<2x1x128xf32>
    %c0_3 = arith.constant 0 : index
    %c0_4 = arith.constant 0 : index
    %4 = vector.load %arg3[%c0_3, %c0_4] : memref<1x128xi32, #tpu.memory_space<vmem>>, vector<1x128xi32>
    %c0_5 = arith.constant 0 : index
    %c0_6 = arith.constant 0 : index
    %c0_7 = arith.constant 0 : index
    %5 = vector.load %arg4[%c0_5, %c0_6, %c0_7] : memref<2x1x1xf32, #tpu.memory_space<vmem>>, vector<2x1x1xf32>
    %cst = arith.constant dense<0xFF800000> : vector<1x128xf32>
    %6 = vector.multi_reduction <maximumf>, %3, %cst [0] : vector<2x1x128xf32> to vector<1x128xf32>
    %7 = vector.shape_cast %6 : vector<1x128xf32> to vector<1x1x128xf32>
    %8 = vector.broadcast %7 : vector<1x1x128xf32> to vector<2x1x128xf32>
    %9 = arith.subf %3, %8 : vector<2x1x128xf32>
    %10 = math.exp %9 : vector<2x1x128xf32>
    %cst_8 = arith.constant dense<0.000000e+00> : vector<1x128xf32>
    %11 = vector.multi_reduction <add>, %10, %cst_8 [0] : vector<2x1x128xf32> to vector<1x128xf32>
    %12 = vector.shape_cast %11 : vector<1x128xf32> to vector<1x1x128xf32>
    %13 = math.log %12 : vector<1x1x128xf32>
    %14 = vector.broadcast %13 : vector<1x1x128xf32> to vector<2x1x128xf32>
    %15 = arith.subf %9, %14 : vector<2x1x128xf32>
    %16 = tpu.iota {dimensions = array<i32: 0>} : vector<2x1x128xi32>
    %17 = vector.shape_cast %4 : vector<1x128xi32> to vector<1x1x128xi32>
    %18 = vector.broadcast %17 : vector<1x1x128xi32> to vector<2x1x128xi32>
    %19 = arith.cmpi eq, %16, %18 : vector<2x1x128xi32>
    %cst_9 = arith.constant 0.000000e+00 : f32
    %20 = vector.broadcast %cst_9 : f32 to vector<2x1x1xf32>
    %21 = arith.subf %20, %5 : vector<2x1x1xf32>
    %22 = vector.broadcast %21 : vector<2x1x1xf32> to vector<2x1x128xf32>
    %23 = arith.mulf %22, %15 : vector<2x1x128xf32>
    %cst_10 = arith.constant 0.000000e+00 : f32
    %24 = vector.broadcast %cst_10 : f32 to vector<2x1x128xf32>
    %25 = arith.select %19, %23, %24 : vector<2x1x128xi1>, vector<2x1x128xf32>
    %cst_11 = arith.constant dense<0.000000e+00> : vector<1x128xf32>
    %26 = vector.multi_reduction <add>, %25, %cst_11 [0] : vector<2x1x128xf32> to vector<1x128xf32>
    %cst_12 = arith.constant 0.000000e+00 : f32
    %27 = vector.broadcast %cst_12 : f32 to vector<2x1x128xf32>
    %28 = arith.select %19, %15, %27 : vector<2x1x128xi1>, vector<2x1x128xf32>
    %cst_13 = arith.constant dense<0.000000e+00> : vector<1x128xf32>
    %29 = vector.multi_reduction <add>, %28, %cst_13 [0] : vector<2x1x128xf32> to vector<1x128xf32>
    %30 = math.exp %29 : vector<1x128xf32>
    %cst_14 = arith.constant 1.000000e+00 : f32
    %31 = vector.broadcast %cst_14 : f32 to vector<1x128xf32>
    %32 = arith.mulf %31, %30 : vector<1x128xf32>
    %33 = arith.subf %26, %32 : vector<1x128xf32>
    %c1_i32 = arith.constant 1 : i32
    %34 = arith.muli %arg0, %c1_i32 : i32
    %35 = arith.addi %34, %arg1 : i32
    %c1_i32_15 = arith.constant 1 : i32
    %36 = arith.muli %35, %c1_i32_15 : i32
    %37 = tpu.iota {dimensions = array<i32: 0>} : vector<1x128xi32>
    %38 = tpu.iota {dimensions = array<i32: 1>} : vector<1x128xi32>
    %39 = vector.broadcast %36 : i32 to vector<1x128xi32>
    %40 = arith.addi %39, %37 : vector<1x128xi32>
    %c128_i32 = arith.constant 128 : i32
    %41 = vector.broadcast %c128_i32 : i32 to vector<1x128xi32>
    %42 = arith.muli %40, %41 : vector<1x128xi32>
    %43 = arith.addi %42, %38 : vector<1x128xi32>
    %c0_16 = arith.constant 0 : index
    %c0_17 = arith.constant 0 : index
    %44 = vector.load %arg6[%c0_16, %c0_17] : memref<1x128xf32, #tpu.memory_space<vmem>>, vector<1x128xf32>
    %c16_i32 = arith.constant 16 : i32
    %45 = vector.broadcast %c16_i32 : i32 to vector<1x128xi32>
    %46 = arith.cmpi slt, %43, %45 : vector<1x128xi32>
    %cst_18 = arith.constant 0.000000e+00 : f32
    %47 = vector.broadcast %cst_18 : f32 to vector<1x128xf32>
    %48 = arith.select %46, %33, %47 : vector<1x128xi1>, vector<1x128xf32>
    %49 = arith.addf %44, %48 : vector<1x128xf32>
    %c0_19 = arith.constant 0 : index
    %c0_20 = arith.constant 0 : index
    %50 = vector.load %arg6[%c0_19, %c0_20] : memref<1x128xf32, #tpu.memory_space<vmem>>, vector<1x128xf32>
    tpu.vector_store %arg6[%c0_19, %c0_20], %49 {strides = array<i32>} : memref<1x128xf32, #tpu.memory_space<vmem>>, vector<1x128xf32>,
    %c0_i32_21 = arith.constant 0 : i32
    %51 = arith.cmpi eq, %arg1, %c0_i32_21 : i32
    %52 = arith.extui %51 : i1 to i32
    %c0_i32_22 = arith.constant 0 : i32
    %53 = arith.cmpi ne, %52, %c0_i32_22 : i32
    scf.if %53 {
      %c0_23 = arith.constant 0 : index
      %c0_24 = arith.constant 0 : index
      %54 = vector.load %arg6[%c0_23, %c0_24] : memref<1x128xf32, #tpu.memory_space<vmem>>, vector<1x128xf32>
      %55 = vector.shape_cast %54 : vector<1x128xf32> to vector<1x1x128xf32>
      %cst_25 = arith.constant dense<0.000000e+00> : vector<1xf32>
      %56 = vector.multi_reduction <add>, %55, %cst_25 [1, 2] : vector<1x1x128xf32> to vector<1xf32>
      %57 = vector.shape_cast %56 : vector<1xf32> to vector<1x1x1xf32>
      %58 = vector.extract %57[0, 0, 0] : f32 from vector<1x1x1xf32>
      %59 = vector.broadcast %58 : f32 to vector<1x1x1xf32>
      %c0_26 = arith.constant 0 : index
      %c0_27 = arith.constant 0 : index
      %c0_28 = arith.constant 0 : index
      %60 = vector.load %arg5[%c0_26, %c0_27, %c0_28] : memref<1x1x1xf32, #tpu.memory_space<vmem>>, vector<1x1x1xf32>
      tpu.vector_store %arg5[%c0_26, %c0_27, %c0_28], %59 {strides = array<i32>} : memref<1x1x1xf32, #tpu.memory_space<vmem>>, vector<1x1x1xf32>,
    } else {
    }
    return
  }
  func.func @transform_0(%arg0: i32, %arg1: i32) -> (i32, i32, i32) {
    %c1_i32 = arith.constant 1 : i32
    %0 = arith.muli %arg0, %c1_i32 : i32
    %1 = arith.addi %0, %arg1 : i32
    %c0_i32 = arith.constant 0 : i32
    %2 = arith.minsi %1, %c0_i32 : i32
    %c0_i32_0 = arith.constant 0 : i32
    %c0_i32_1 = arith.constant 0 : i32
    %c0_i32_2 = arith.constant 0 : i32
    return %c0_i32_0, %2, %c0_i32_1 : i32, i32, i32
  }
  func.func @transform_1(%arg0: i32, %arg1: i32) -> (i32, i32) {
    %c1_i32 = arith.constant 1 : i32
    %0 = arith.muli %arg0, %c1_i32 : i32
    %1 = arith.addi %0, %arg1 : i32
    %c0_i32 = arith.constant 0 : i32
    %2 = arith.minsi %1, %c0_i32 : i32
    %c0_i32_0 = arith.constant 0 : i32
    %c0_i32_1 = arith.constant 0 : i32
    return %2, %c0_i32_0 : i32, i32
  }
  func.func @transform_2(%arg0: i32, %arg1: i32) -> (i32, i32, i32) {
    %c0_i32 = arith.constant 0 : i32
    %c0_i32_0 = arith.constant 0 : i32
    %c0_i32_1 = arith.constant 0 : i32
    %c0_i32_2 = arith.constant 0 : i32
    return %c0_i32, %c0_i32_0, %c0_i32_1 : i32, i32, i32
  }
  func.func @transform_3(%arg0: i32, %arg1: i32) -> (i32, i32, i32) {
    %c0_i32 = arith.constant 0 : i32
    %c0_i32_0 = arith.constant 0 : i32
    %c0_i32_1 = arith.constant 0 : i32
    return %arg0, %c0_i32, %c0_i32_0 : i32, i32, i32
  }
}

</mosaic_0001>

<bundles_post_ra>
// kernel: tpu_custom_call.1
= control target key start
LH: loop header
LB: loop body
LE: loop exit
PB: predicated region body
PF: predicated region fallthrough
CT: control target
= control target key end

     0   :  { %v218_v2 = vmov 0   ;;  %s270_s0 = inlined_call_operand.vmem [shape: f32[2,1,128], index: 0, kind: input, shape index: {}]   ;;  %s271_s1 = inlined_call_operand.vmem [shape: s32[1,128], index: 1, kind: input, shape index: {}]   ;;  %s272_s2 = inlined_call_operand.vmem [shape: f32[2,1,1], index: 2, kind: input, shape index: {}]   ;;  %s273_s3 = inlined_call_operand.hbm [shape: f32[1,1,1], index: 3, kind: output, shape index: {}]  }
   0x1   :  { %v71_v0 = vld [vmem:[%s272_s2] sm:$0x1]  ;;  %v72_v1 = vld [vmem:[%s272_s2 + $0x1] sm:$0x1]  ;;  %187 = vset.pattern.permute.xlu0 %v218_v2 }
   0x2   :  { %v96_v3 = vsub.f32 0.0, %v71_v0  ;;  %v97_v4 = vsub.f32 0.0, %v72_v1 }
   0x4   :  { %100 = vperm.xlu0 %187, %v96_v3  }
   0x5   :  { %8 = vsyncpa [#allocation4], 0  ;;  %v219_v5 = vmov 0.0   ;;  %v73_v6 = vlaneseq  ;;  %v68_v7 = vld [vmem:[%s270_s0] sm:$0x1]  ;;  %vm86_vm1 = vcmask 1040384  }
   0x6   :  { %67 = vst [vmem:[#allocation2] sm:$0x1] %v219_v5  ;;  %v69_v8 = vld [vmem:[%s270_s0 + $0x1] sm:$0x1]  ;;  %v70_v23 = vld [vmem:[%s271_s1] sm:$0x1] }
   0x7   :  { %vm75_vm0 = vcmp.lt.s32.totalorder %v73_v6, 128  ;;  %vm94_vm2 = vcmp.eq.s32.totalorder %v70_v23, 0  ;;  %vm95_vm3 = vcmp.eq.s32.totalorder %v70_v23, 1  ;;  %v104_v31 = vshrl.u32 %v73_v6, 7  ;;  %s220_s1 = smov [#allocation3]  }
   0x8   :  { %109 = vperm.xlu0 %187, %v97_v4   ;;  %v77_v9 = vsel %vm75_vm0, %v68_v7, -inf  ;;  %v78_v10 = vsel %vm75_vm0, %v69_v8, -inf  ;;  %v135_v37 = vand.u32 127, %v73_v6  ;;  %s168_s20 = sshll.u32 %s220_s1, 4  ;;  %vm160_vm5 = vcmask 0   ;;  %s169_s20 = int_to_ptr.vmem [resolvable:$true] %s168_s20 }
   0x9   :  { %v79_v11 = vmax.f32 %v77_v9, %v78_v10  ;;  %v105_v33 = vsub.s32 0, %v104_v31  ;;  %v138_v38 = vmul.u32 128, %v104_v31  ;;  %s196_s22 = scalar_lea.vmem %s169_s20, 16  ;;  %s200_s23 = scalar_lea.vmem %s169_s20, 32 }
   0xa   :  { %p197_p0 = scmp.ne.s32.totalorder %s169_s20, %s196_s22  ;;  %p201_p1 = scmp.lt.s32.totalorder %s169_s20, %s169_s20 }
   0xb   :  { %v80_v12 = vsub.f32 %v68_v7, %v79_v11  ;;  %v81_v13 = vsub.f32 %v69_v8, %v79_v11  ;;  %v139_v43 = vadd.s32 %v138_v38, %v135_v37  ;;  %p202_p2 = scmp.lt.s32.totalorder %s200_s23, %s196_s22 }
   0xd   :  { %v82_v14 = vmul.f32 1.442695, %v80_v12  ;;  %v84_v15 = vmul.f32 1.442695, %v81_v13  ;;  %vm141_vm4 = vcmp.lt.s32.totalorder %v139_v43, 16  ;;  %p203_p3 = por %p202_p2, %p201_p1 }
   0xe   :  { %v140_v50 = vld [vmem:[#allocation2] sm:$0x1] }
   0xf   :  { %188 = vpow2.f32 %v82_v14  ;;  %p204_p4 = pnand %p203_p3, %p197_p0 }
  0x10   :  { %190 = vpow2.f32 %v84_v15 }
  0x1c   :  { %v189_v16 = vpop.eup %188 }
  0x1d   :  { %v191_v17 = vpop.eup %190  ;;  %v87_v18 = vsel %vm86_vm1, %v189_v16, 0.0 }
  0x1e   :  { %v88_v19 = vsel %vm86_vm1, %v191_v17, 0.0 }
  0x1f   :  { %v89_v20 = vadd.f32 %v88_v19, %v87_v18 }
  0x21   :  { %192 = vlog2.f32 %v89_v20 }
  0x2e   :  { %v193_v21 = vpop.eup %192 }
  0x2f   :  { %v91_v22 = vmul.f32 0.6931472, %v193_v21 }
  0x31   :  { %v92_v24 = vsub.f32 %v80_v12, %v91_v22  ;;  %v93_v25 = vsub.f32 %v81_v13, %v91_v22 }
  0x33   :  { %v123_v26 = vsel %vm94_vm2, %v92_v24, 0.0  ;;  %v124_v27 = vsel %vm95_vm3, %v93_v25, 0.0 }
  0x34   :  { %v125_v28 = vsel %vm86_vm1, %v123_v26, 0.0  ;;  %v126_v29 = vsel %vm86_vm1, %v124_v27, 0.0 }
  0x35   :  { %v127_v30 = vadd.f32 %v126_v29, %v125_v28 }
  0x37   :  { %v128_v32 = vmul.f32 1.442695, %v127_v30 }
  0x39   :  { %194 = vpow2.f32 %v128_v32 }
  0x46   :  { %v195_v45 = vpop.eup %194 }
  0x7f   :  { %v101_v34 = vpop.permute.xlu0 %100 }
  0x80   :  { %v106_v35 = vrot.slane %v101_v34, %v105_v33 }
  0x82   :  { %v116_v36 = vmul.f32 %v106_v35, %v92_v24 }
  0x83   :  { %v110_v39 = vpop.permute.xlu0 %109 }
  0x84   :  { %v115_v40 = vrot.slane %v110_v39, %v105_v33  ;;  %v118_v41 = vsel %vm94_vm2, %v116_v36, 0.0 }
  0x85   :  { %v120_v46 = vsel %vm86_vm1, %v118_v41, 0.0 }
  0x86   :  { %v117_v42 = vmul.f32 %v115_v40, %v93_v25 }
  0x88   :  { %v119_v44 = vsel %vm95_vm3, %v117_v42, 0.0 }
  0x89   :  { %v121_v47 = vsel %vm86_vm1, %v119_v44, 0.0 }
  0x8a   :  { %v122_v48 = vadd.f32 %v121_v47, %v120_v46 }
  0x8c   :  { %v130_v49 = vsub.f32 %v122_v48, %v195_v45 }
  0x8e   :  { %v142_v51 = vsel %vm141_vm4, %v130_v49, 0.0 }
  0x8f   :  { %v143_v52 = vadd.f32 %v142_v51, %v140_v50 }
  0x91   :  { %144 = vst [vmem:[#allocation2] sm:$0x1] %v143_v52 }
  0x98   :  { %v148_v53 = vld [vmem:[#allocation2] sm:$0x1] }
  0x99   :  { %v149_v54 = vsel %vm86_vm1, %v148_v53, 0.0 }
  0x9a   :  { %150 = vadd.xlane.f32.xlu1 %v149_v54 }
 0x123   :  { %v151_v55 = vpop.xlane.xlu1 %150 }
 0x124   :  { %v152_v56 = vrot.slane %v151_v55, 4 }
 0x126   :  { %v153_v57 = vadd.f32 %v152_v56, %v151_v55 }
 0x128   :  { %v154_v58 = vrot.slane %v153_v57, 2 }
 0x12a   :  { %v155_v59 = vadd.f32 %v154_v58, %v153_v57 }
 0x12c   :  { %v156_v60 = vrot.slane %v155_v59, 1 }
 0x12e   :  { %v157_v61 = vadd.f32 %v156_v60, %v155_v59 }
 0x130   :  { %182 = vpush %v157_v61 }
 0x161   :  { %s183_s21 = spop %182 }
 0x162   :  { %v159_v62 = vstv %s183_s21 }
 0x163   :  { %161 = vst.msk [vmem:[#allocation3] sm:$0x1] %vm160_vm5, %v159_v62 }
 0x164   :  { %207 = shalt.err (!%p204_p4)
}
 0x165   :  { %171 = dma.vmem_to_hbm [thread:$0]  %s169_s20, 16, %s273_s3, [#allocation4]  }
 0x166   :  { %216 = dma.done.wait [#allocation4], 16  }
 0x167   :  { %217 = vsyncadd [#allocation4], 4294967280 }
 0x168   :  { %175 = vsyncpa [#allocation4], 1 }

</bundles_post_ra>
